<compile_context>
chip_gen: v7x
topology: tpu7x:2x2x1
jax: 0.10.0
libtpu: 0.0.40
codegen_flags: <defaults>
</compile_context>

<pallas_src>
import functools
import math

import jax
import jax.numpy as jnp
from jax import lax
from jax.experimental import pallas as pl
from jax.experimental.pallas import tpu as pltpu

# dot_general dimension-number shorthands (2D, no batch dims).
_NN = (((1,), (0,)), ((), ()))   # A   @ B
_TN = (((0,), (0,)), ((), ()))   # A^T @ B
_NT = (((1,), (1,)), ((), ()))   # A   @ B^T


def hypergraph_gnn_kernel(x_ref, h_ref, w_in_ref, we_ref, wn_ref, w1_ref, w2dt_ref,
                          o_ref, *, n_layers, pomo, inv_sqrt_dim, logit_clipping,
                          clip_logits):
    f32, bf16 = jnp.float32, jnp.bfloat16
    P = pomo
    H = h_ref[0]                     # (N, E) bf16 incidence (shared over P)
    N, E = H.shape
    D = w_in_ref.shape[1]

    def to_wide(tall, rows):
        # (P*rows, D) p-major  ->  (rows, P*D); lane-aligned (D=multiple of 128) concat.
        return jnp.concatenate(
            [tall[p * rows:(p + 1) * rows, :] for p in range(P)], axis=1)

    def to_tall(wide):
        # (rows, P*D)  ->  (P*rows, D) p-major; lane-aligned column slices.
        return jnp.concatenate(
            [wide[:, p * D:(p + 1) * D] for p in range(P)], axis=0)

    # ---- in_proj: Linear(node_in_dim -> D), bias=False.  M = P*N rows. ----
    x = lax.dot_general(x_ref[0], w_in_ref[...], _NN,
                        preferred_element_type=f32)                       # (P*N, D)

    # ---- n_layers x HypergraphConv (static unroll) ----
    for l in range(n_layers):
        x_wide = to_wide(x.astype(bf16), N)                               # (N, P*D)
        # node -> hyperedge aggregation: one (E,N)x(N,P*D) matmul (H^T via TN dims).
        e_wide = lax.dot_general(H, x_wide, _TN,
                                 preferred_element_type=f32)              # (E, P*D)
        e = to_tall(e_wide).astype(bf16)                                  # (P*E, D)
        e = jnp.maximum(lax.dot_general(e, we_ref[l], _NN,
                                        preferred_element_type=f32), 0.0)  # edge_linear
        e_wide = to_wide(e.astype(bf16), E)                               # (E, P*D)
        # hyperedge -> node aggregation: one (N,E)x(E,P*D) matmul.
        xa_wide = lax.dot_general(H, e_wide, _NN,
                                  preferred_element_type=f32)             # (N, P*D)
        xa = to_tall(xa_wide).astype(bf16)                                # (P*N, D)
        x = jnp.maximum(lax.dot_general(xa, wn_ref[l], _NN,
                                        preferred_element_type=f32), 0.0)  # node_linear

    # ---- MLP first linear + ReLU (dropout = identity at inference) ----
    z = jnp.maximum(lax.dot_general(x.astype(bf16), w1_ref[...], _NN,
                                    preferred_element_type=f32), 0.0)     # (P*N, DM)

    # ---- folded (MLP-2nd-linear @ decoder) computed transposed for a lane-dense
    #      output: (OD, DM) x (P*N, DM)^T -> (OD, P*N) ----
    logits = lax.dot_general(w2dt_ref[...], z.astype(bf16), _NT,
                             preferred_element_type=f32)                  # (OD, P*N)

    if clip_logits:
        logits = logit_clipping * jnp.tanh(logits * inv_sqrt_dim)
    o_ref[0] = logits.astype(o_ref.dtype)


def hypergraph_gnn_forward(node_features, incidence, w_in, we, wn, w1, w2, wd,
                           *, logit_clipping=10.0):
    """node_features: (B, P, N, node_in_dim), incidence: (B, N, E) -> (B, P, N, out_dim)."""
    B, P, N, Fin = node_features.shape
    E = incidence.shape[-1]
    D = w_in.shape[1]
    DM = w1.shape[1]
    OD = wd.shape[1]
    L = we.shape[0]
    assert L >= 1, "expect at least one HypergraphConv layer"

    bf = jnp.bfloat16
    # bf16 MXU operands (f32 accumulation in-kernel).
    x_b = node_features.reshape(B, P * N, Fin).astype(bf)       # p-major rows
    h_b = incidence.astype(bf)                                   # (B, N, E), single copy
    # Fold decoder into the 2nd MLP linear (no nonlinearity/bias between them),
    # pre-transposed so the kernel emits (OD, P*N) lane-dense logits.
    w2dt_b = jnp.transpose(jnp.matmul(w2, wd)).astype(bf)        # (OD, DM)
    w_in_b, we_b, wn_b, w1_b = (w.astype(bf) for w in (w_in, we, wn, w1))

    kernel = functools.partial(
        hypergraph_gnn_kernel,
        n_layers=L,
        pomo=P,
        inv_sqrt_dim=1.0 / math.sqrt(D),
        logit_clipping=float(logit_clipping),
        clip_logits=logit_clipping > 0.0,
    )

    flops_per_b = (
        2 * P * N * Fin * D
        + L * (4 * P * N * E * D + 2 * P * E * D * D + 2 * P * N * D * D)
        + 2 * P * N * D * DM
        + 2 * P * N * DM * OD
    )
    cost = pl.CostEstimate(
        flops=B * flops_per_b,
        transcendentals=(B * P * N * OD) if logit_clipping > 0.0 else 0,
        bytes_accessed=(2 * B * P * N * Fin + 2 * B * N * E
                        + 2 * (Fin * D + 2 * L * D * D + D * DM + OD * DM)
                        + 4 * B * OD * P * N),
    )

    out = pl.pallas_call(
        kernel,
        out_shape=jax.ShapeDtypeStruct((B, OD, P * N), jnp.float32),
        grid_spec=pltpu.PrefetchScalarGridSpec(
            num_scalar_prefetch=0,
            grid=(B,),                                            # one step per instance
            in_specs=[
                pl.BlockSpec((1, P * N, Fin), lambda b: (b, 0, 0)),   # node features
                pl.BlockSpec((1, N, E), lambda b: (b, 0, 0)),         # incidence H
                pl.BlockSpec((Fin, D), lambda b: (0, 0)),             # in_proj weight
                pl.BlockSpec((L, D, D), lambda b: (0, 0, 0)),         # edge_linear stack
                pl.BlockSpec((L, D, D), lambda b: (0, 0, 0)),         # node_linear stack
                pl.BlockSpec((D, DM), lambda b: (0, 0)),              # MLP w1
                pl.BlockSpec((OD, DM), lambda b: (0, 0)),             # folded (w2@wd)^T
            ],
            out_specs=pl.BlockSpec((1, OD, P * N), lambda b: (b, 0, 0)),
        ),
        compiler_params=pltpu.CompilerParams(
            dimension_semantics=("parallel",),
            vmem_limit_bytes=32 * 1024 * 1024,
        ),
        cost_estimate=cost,
    )(x_b, h_b, w_in_b, we_b, wn_b, w1_b, w2dt_b)

    # (B, OD, P*N) with columns ordered p-major -> (B, P, N, OD)
    return out.reshape(B, OD, P, N).transpose(0, 2, 3, 1)


def reference(node_features, incidence, w_in, we, wn, w1, w2, wd,
              hidden_dim, logit_clipping):
    """Pure-JAX reference mirroring the torch module (un-folded decoder, bf16 operands,
    f32 accumulation)."""
    bf, f32 = jnp.bfloat16, jnp.float32
    B, P, N, Fin = node_features.shape
    E = incidence.shape[-1]

    def mm(a, b):
        return lax.dot_general(a.astype(bf), b.astype(bf),
                               (((a.ndim - 1,), (0,)), ((), ())),
                               preferred_element_type=f32)

    x = mm(node_features.reshape(B * P, N, Fin), w_in)                      # (BP, N, D)
    H = jnp.broadcast_to(incidence[:, None], (B, P, N, E)).reshape(B * P, N, E).astype(bf)
    for l in range(we.shape[0]):
        e_agg = jnp.einsum('bne,bnd->bed', H, x.astype(bf), preferred_element_type=f32)
        e_h = jnp.maximum(mm(e_agg, we[l]), 0.0)
        x_agg = jnp.einsum('bne,bed->bnd', H, e_h.astype(bf), preferred_element_type=f32)
        x = jnp.maximum(mm(x_agg, wn[l]), 0.0)
    z = jnp.maximum(mm(x, w1), 0.0)
    h = mm(z, w2)
    logits = mm(h, wd)
    out = logits.reshape(B, P, N, -1)
    if logit_clipping > 0.0:
        out = logit_clipping * jnp.tanh(out / math.sqrt(hidden_dim))
    return out


if __name__ == "__main__":
    # Module hyper-params (hidden_dim=128 / n_layers=3 / mult_hidden=4 are module defaults).
    node_in_dim = 4
    hidden_dim = 128
    n_layers = 3
    mult_hidden = 4
    node_out_dim = 1
    logit_clipping = 10.0
    B, P, N, E = 2, 2, 16, 8          # batch, pomo, nodes, hyperedges

    key = jax.random.PRNGKey(0)
    keys = jax.random.split(key, 8)

    node_features = jax.random.normal(keys[0], (B, P, N, node_in_dim), dtype=jnp.float32)
    incidence = (jax.random.uniform(keys[1], (B, N, E)) < 0.4).astype(jnp.float32)

    def uinit(k, shape, fan_in):
        lim = 1.0 / math.sqrt(fan_in)
        return jax.random.uniform(k, shape, minval=-lim, maxval=lim, dtype=jnp.float32)

    # Weights stored in (in, out) layout (= transposed torch nn.Linear weights).
    w_in = uinit(keys[2], (node_in_dim, hidden_dim), node_in_dim)
    we = uinit(keys[3], (n_layers, hidden_dim, hidden_dim), hidden_dim)
    wn = uinit(keys[4], (n_layers, hidden_dim, hidden_dim), hidden_dim)
    w1 = uinit(keys[5], (hidden_dim, mult_hidden * hidden_dim), hidden_dim)
    w2 = uinit(keys[6], (mult_hidden * hidden_dim, hidden_dim), mult_hidden * hidden_dim)
    wd = uinit(keys[7], (hidden_dim, node_out_dim), hidden_dim)

    out = hypergraph_gnn_forward(node_features, incidence, w_in, we, wn, w1, w2, wd,
                                 logit_clipping=logit_clipping)
    out = jax.block_until_ready(out)

    ref = reference(node_features, incidence, w_in, we, wn, w1, w2, wd,
                    hidden_dim, logit_clipping)

    assert out.shape == (B, P, N, node_out_dim), f"bad output shape {out.shape}"
    max_err = jnp.max(jnp.abs(out - ref))
    assert jnp.allclose(out, ref, atol=2e-2, rtol=2e-2), f"mismatch vs reference (max abs err {max_err})"

    print("KERNEL_OK")
</pallas_src>

<mosaic_0001>
module attributes {stable_mosaic.version = 11 : i64} {
  func.func @hypergraph_gnn_kernel(%arg0: i32, %arg1: memref<1x32x4xbf16, #tpu.memory_space<vmem>>, %arg2: memref<1x16x8xbf16, #tpu.memory_space<vmem>>, %arg3: memref<4x128xbf16, #tpu.memory_space<vmem>>, %arg4: memref<3x128x128xbf16, #tpu.memory_space<vmem>>, %arg5: memref<3x128x128xbf16, #tpu.memory_space<vmem>>, %arg6: memref<128x512xbf16, #tpu.memory_space<vmem>>, %arg7: memref<1x512xbf16, #tpu.memory_space<vmem>>, %arg8: memref<1x1x32xf32, #tpu.memory_space<vmem>>) attributes {dimension_semantics = [#tpu.dimension_semantics<parallel>], iteration_bounds = array<i64: 2>, scalar_prefetch = 0 : i64, scratch_operands = 0 : i64, tpu.core_type = #tpu.core_type<tc>, window_params = [{transform_indices = @transform_0, window_bounds = array<i64: 1, 32, 4>}, {transform_indices = @transform_1, window_bounds = array<i64: 1, 16, 8>}, {pipeline_mode = #tpu.pipeline_mode<synchronous>, transform_indices = @transform_2, window_bounds = array<i64: 4, 128>}, {pipeline_mode = #tpu.pipeline_mode<synchronous>, transform_indices = @transform_3, window_bounds = array<i64: 3, 128, 128>}, {pipeline_mode = #tpu.pipeline_mode<synchronous>, transform_indices = @transform_4, window_bounds = array<i64: 3, 128, 128>}, {pipeline_mode = #tpu.pipeline_mode<synchronous>, transform_indices = @transform_5, window_bounds = array<i64: 128, 512>}, {pipeline_mode = #tpu.pipeline_mode<synchronous>, transform_indices = @transform_6, window_bounds = array<i64: 1, 512>}, {transform_indices = @transform_7, window_bounds = array<i64: 1, 1, 32>}]} {
    %c0 = arith.constant 0 : index
    %c0_0 = arith.constant 0 : index
    %c0_1 = arith.constant 0 : index
    %0 = vector.load %arg2[%c0, %c0_0, %c0_1] : memref<1x16x8xbf16, #tpu.memory_space<vmem>>, vector<1x16x8xbf16>
    %1 = vector.shape_cast %0 : vector<1x16x8xbf16> to vector<16x8xbf16>
    %c0_2 = arith.constant 0 : index
    %c0_3 = arith.constant 0 : index
    %c0_4 = arith.constant 0 : index
    %2 = vector.load %arg1[%c0_2, %c0_3, %c0_4] : memref<1x32x4xbf16, #tpu.memory_space<vmem>>, vector<1x32x4xbf16>
    %3 = vector.shape_cast %2 : vector<1x32x4xbf16> to vector<32x4xbf16>
    %c0_5 = arith.constant 0 : index
    %c0_6 = arith.constant 0 : index
    %4 = vector.load %arg3[%c0_5, %c0_6] : memref<4x128xbf16, #tpu.memory_space<vmem>>, vector<4x128xbf16>
    %cst = arith.constant dense<0.000000e+00> : vector<32x128xf32>
    %5 = tpu.matmul %3, %4, %cst {dimension_numbers = #tpu.dot_dimension_numbers<[1], [0], [0], [1], [0, 0, 1, 1], [], []>} : vector<32x4xbf16>, vector<4x128xbf16>, vector<32x128xf32> -> vector<32x128xf32>
    %6 = arith.truncf %5 : vector<32x128xf32> to vector<32x128xbf16>
    %7 = vector.extract_strided_slice %6 {offsets = [0, 0], sizes = [16, 128], strides = [1, 1]} : vector<32x128xbf16> to vector<16x128xbf16>
    %8 = vector.extract_strided_slice %6 {offsets = [16, 0], sizes = [16, 128], strides = [1, 1]} : vector<32x128xbf16> to vector<16x128xbf16>
    %9 = tpu.concatenate %7, %8 in 1 : vector<16x128xbf16>, vector<16x128xbf16> -> vector<16x256xbf16>
    %cst_7 = arith.constant dense<0.000000e+00> : vector<8x256xf32>
    %10 = tpu.matmul %1, %9, %cst_7 {dimension_numbers = #tpu.dot_dimension_numbers<[0], [0], [1], [1], [0, 1, 1, 1], [], []>} : vector<16x8xbf16>, vector<16x256xbf16>, vector<8x256xf32> -> vector<8x256xf32>
    %11 = vector.extract_strided_slice %10 {offsets = [0, 0], sizes = [8, 128], strides = [1, 1]} : vector<8x256xf32> to vector<8x128xf32>
    %12 = vector.extract_strided_slice %10 {offsets = [0, 128], sizes = [8, 128], strides = [1, 1]} : vector<8x256xf32> to vector<8x128xf32>
    %13 = tpu.concatenate %11, %12 in 0 : vector<8x128xf32>, vector<8x128xf32> -> vector<16x128xf32>
    %14 = arith.truncf %13 : vector<16x128xf32> to vector<16x128xbf16>
    %c0_8 = arith.constant 0 : index
    %c0_9 = arith.constant 0 : index
    %c0_10 = arith.constant 0 : index
    %15 = vector.load %arg4[%c0_8, %c0_9, %c0_10] : memref<3x128x128xbf16, #tpu.memory_space<vmem>>, vector<1x128x128xbf16>
    %16 = vector.shape_cast %15 : vector<1x128x128xbf16> to vector<128x128xbf16>
    %cst_11 = arith.constant dense<0.000000e+00> : vector<16x128xf32>
    %17 = tpu.matmul %14, %16, %cst_11 {dimension_numbers = #tpu.dot_dimension_numbers<[1], [0], [0], [1], [0, 0, 1, 1], [], []>} : vector<16x128xbf16>, vector<128x128xbf16>, vector<16x128xf32> -> vector<16x128xf32>
    %cst_12 = arith.constant 0.000000e+00 : f32
    %18 = vector.broadcast %cst_12 : f32 to vector<16x128xf32>
    %19 = arith.maximumf %17, %18 : vector<16x128xf32>
    %20 = arith.truncf %19 : vector<16x128xf32> to vector<16x128xbf16>
    %21 = vector.extract_strided_slice %20 {offsets = [0, 0], sizes = [8, 128], strides = [1, 1]} : vector<16x128xbf16> to vector<8x128xbf16>
    %22 = vector.extract_strided_slice %20 {offsets = [8, 0], sizes = [8, 128], strides = [1, 1]} : vector<16x128xbf16> to vector<8x128xbf16>
    %23 = tpu.concatenate %21, %22 in 1 : vector<8x128xbf16>, vector<8x128xbf16> -> vector<8x256xbf16>
    %cst_13 = arith.constant dense<0.000000e+00> : vector<16x256xf32>
    %24 = tpu.matmul %1, %23, %cst_13 {dimension_numbers = #tpu.dot_dimension_numbers<[1], [0], [0], [1], [0, 0, 1, 1], [], []>} : vector<16x8xbf16>, vector<8x256xbf16>, vector<16x256xf32> -> vector<16x256xf32>
    %25 = vector.extract_strided_slice %24 {offsets = [0, 0], sizes = [16, 128], strides = [1, 1]} : vector<16x256xf32> to vector<16x128xf32>
    %26 = vector.extract_strided_slice %24 {offsets = [0, 128], sizes = [16, 128], strides = [1, 1]} : vector<16x256xf32> to vector<16x128xf32>
    %27 = tpu.concatenate %25, %26 in 0 : vector<16x128xf32>, vector<16x128xf32> -> vector<32x128xf32>
    %28 = arith.truncf %27 : vector<32x128xf32> to vector<32x128xbf16>
    %c0_14 = arith.constant 0 : index
    %c0_15 = arith.constant 0 : index
    %c0_16 = arith.constant 0 : index
    %29 = vector.load %arg5[%c0_14, %c0_15, %c0_16] : memref<3x128x128xbf16, #tpu.memory_space<vmem>>, vector<1x128x128xbf16>
    %30 = vector.shape_cast %29 : vector<1x128x128xbf16> to vector<128x128xbf16>
    %cst_17 = arith.constant dense<0.000000e+00> : vector<32x128xf32>
    %31 = tpu.matmul %28, %30, %cst_17 {dimension_numbers = #tpu.dot_dimension_numbers<[1], [0], [0], [1], [0, 0, 1, 1], [], []>} : vector<32x128xbf16>, vector<128x128xbf16>, vector<32x128xf32> -> vector<32x128xf32>
    %cst_18 = arith.constant 0.000000e+00 : f32
    %32 = vector.broadcast %cst_18 : f32 to vector<32x128xf32>
    %33 = arith.maximumf %31, %32 : vector<32x128xf32>
    %34 = arith.truncf %33 : vector<32x128xf32> to vector<32x128xbf16>
    %35 = vector.extract_strided_slice %34 {offsets = [0, 0], sizes = [16, 128], strides = [1, 1]} : vector<32x128xbf16> to vector<16x128xbf16>
    %36 = vector.extract_strided_slice %34 {offsets = [16, 0], sizes = [16, 128], strides = [1, 1]} : vector<32x128xbf16> to vector<16x128xbf16>
    %37 = tpu.concatenate %35, %36 in 1 : vector<16x128xbf16>, vector<16x128xbf16> -> vector<16x256xbf16>
    %cst_19 = arith.constant dense<0.000000e+00> : vector<8x256xf32>
    %38 = tpu.matmul %1, %37, %cst_19 {dimension_numbers = #tpu.dot_dimension_numbers<[0], [0], [1], [1], [0, 1, 1, 1], [], []>} : vector<16x8xbf16>, vector<16x256xbf16>, vector<8x256xf32> -> vector<8x256xf32>
    %39 = vector.extract_strided_slice %38 {offsets = [0, 0], sizes = [8, 128], strides = [1, 1]} : vector<8x256xf32> to vector<8x128xf32>
    %40 = vector.extract_strided_slice %38 {offsets = [0, 128], sizes = [8, 128], strides = [1, 1]} : vector<8x256xf32> to vector<8x128xf32>
    %41 = tpu.concatenate %39, %40 in 0 : vector<8x128xf32>, vector<8x128xf32> -> vector<16x128xf32>
    %42 = arith.truncf %41 : vector<16x128xf32> to vector<16x128xbf16>
    %c1 = arith.constant 1 : index
    %c0_20 = arith.constant 0 : index
    %c0_21 = arith.constant 0 : index
    %43 = vector.load %arg4[%c1, %c0_20, %c0_21] : memref<3x128x128xbf16, #tpu.memory_space<vmem>>, vector<1x128x128xbf16>
    %44 = vector.shape_cast %43 : vector<1x128x128xbf16> to vector<128x128xbf16>
    %cst_22 = arith.constant dense<0.000000e+00> : vector<16x128xf32>
    %45 = tpu.matmul %42, %44, %cst_22 {dimension_numbers = #tpu.dot_dimension_numbers<[1], [0], [0], [1], [0, 0, 1, 1], [], []>} : vector<16x128xbf16>, vector<128x128xbf16>, vector<16x128xf32> -> vector<16x128xf32>
    %cst_23 = arith.constant 0.000000e+00 : f32
    %46 = vector.broadcast %cst_23 : f32 to vector<16x128xf32>
    %47 = arith.maximumf %45, %46 : vector<16x128xf32>
    %48 = arith.truncf %47 : vector<16x128xf32> to vector<16x128xbf16>
    %49 = vector.extract_strided_slice %48 {offsets = [0, 0], sizes = [8, 128], strides = [1, 1]} : vector<16x128xbf16> to vector<8x128xbf16>
    %50 = vector.extract_strided_slice %48 {offsets = [8, 0], sizes = [8, 128], strides = [1, 1]} : vector<16x128xbf16> to vector<8x128xbf16>
    %51 = tpu.concatenate %49, %50 in 1 : vector<8x128xbf16>, vector<8x128xbf16> -> vector<8x256xbf16>
    %cst_24 = arith.constant dense<0.000000e+00> : vector<16x256xf32>
    %52 = tpu.matmul %1, %51, %cst_24 {dimension_numbers = #tpu.dot_dimension_numbers<[1], [0], [0], [1], [0, 0, 1, 1], [], []>} : vector<16x8xbf16>, vector<8x256xbf16>, vector<16x256xf32> -> vector<16x256xf32>
    %53 = vector.extract_strided_slice %52 {offsets = [0, 0], sizes = [16, 128], strides = [1, 1]} : vector<16x256xf32> to vector<16x128xf32>
    %54 = vector.extract_strided_slice %52 {offsets = [0, 128], sizes = [16, 128], strides = [1, 1]} : vector<16x256xf32> to vector<16x128xf32>
    %55 = tpu.concatenate %53, %54 in 0 : vector<16x128xf32>, vector<16x128xf32> -> vector<32x128xf32>
    %56 = arith.truncf %55 : vector<32x128xf32> to vector<32x128xbf16>
    %c1_25 = arith.constant 1 : index
    %c0_26 = arith.constant 0 : index
    %c0_27 = arith.constant 0 : index
    %57 = vector.load %arg5[%c1_25, %c0_26, %c0_27] : memref<3x128x128xbf16, #tpu.memory_space<vmem>>, vector<1x128x128xbf16>
    %58 = vector.shape_cast %57 : vector<1x128x128xbf16> to vector<128x128xbf16>
    %cst_28 = arith.constant dense<0.000000e+00> : vector<32x128xf32>
    %59 = tpu.matmul %56, %58, %cst_28 {dimension_numbers = #tpu.dot_dimension_numbers<[1], [0], [0], [1], [0, 0, 1, 1], [], []>} : vector<32x128xbf16>, vector<128x128xbf16>, vector<32x128xf32> -> vector<32x128xf32>
    %cst_29 = arith.constant 0.000000e+00 : f32
    %60 = vector.broadcast %cst_29 : f32 to vector<32x128xf32>
    %61 = arith.maximumf %59, %60 : vector<32x128xf32>
    %62 = arith.truncf %61 : vector<32x128xf32> to vector<32x128xbf16>
    %63 = vector.extract_strided_slice %62 {offsets = [0, 0], sizes = [16, 128], strides = [1, 1]} : vector<32x128xbf16> to vector<16x128xbf16>
    %64 = vector.extract_strided_slice %62 {offsets = [16, 0], sizes = [16, 128], strides = [1, 1]} : vector<32x128xbf16> to vector<16x128xbf16>
    %65 = tpu.concatenate %63, %64 in 1 : vector<16x128xbf16>, vector<16x128xbf16> -> vector<16x256xbf16>
    %cst_30 = arith.constant dense<0.000000e+00> : vector<8x256xf32>
    %66 = tpu.matmul %1, %65, %cst_30 {dimension_numbers = #tpu.dot_dimension_numbers<[0], [0], [1], [1], [0, 1, 1, 1], [], []>} : vector<16x8xbf16>, vector<16x256xbf16>, vector<8x256xf32> -> vector<8x256xf32>
    %67 = vector.extract_strided_slice %66 {offsets = [0, 0], sizes = [8, 128], strides = [1, 1]} : vector<8x256xf32> to vector<8x128xf32>
    %68 = vector.extract_strided_slice %66 {offsets = [0, 128], sizes = [8, 128], strides = [1, 1]} : vector<8x256xf32> to vector<8x128xf32>
    %69 = tpu.concatenate %67, %68 in 0 : vector<8x128xf32>, vector<8x128xf32> -> vector<16x128xf32>
    %70 = arith.truncf %69 : vector<16x128xf32> to vector<16x128xbf16>
    %c2 = arith.constant 2 : index
    %c0_31 = arith.constant 0 : index
    %c0_32 = arith.constant 0 : index
    %71 = vector.load %arg4[%c2, %c0_31, %c0_32] : memref<3x128x128xbf16, #tpu.memory_space<vmem>>, vector<1x128x128xbf16>
    %72 = vector.shape_cast %71 : vector<1x128x128xbf16> to vector<128x128xbf16>
    %cst_33 = arith.constant dense<0.000000e+00> : vector<16x128xf32>
    %73 = tpu.matmul %70, %72, %cst_33 {dimension_numbers = #tpu.dot_dimension_numbers<[1], [0], [0], [1], [0, 0, 1, 1], [], []>} : vector<16x128xbf16>, vector<128x128xbf16>, vector<16x128xf32> -> vector<16x128xf32>
    %cst_34 = arith.constant 0.000000e+00 : f32
    %74 = vector.broadcast %cst_34 : f32 to vector<16x128xf32>
    %75 = arith.maximumf %73, %74 : vector<16x128xf32>
    %76 = arith.truncf %75 : vector<16x128xf32> to vector<16x128xbf16>
    %77 = vector.extract_strided_slice %76 {offsets = [0, 0], sizes = [8, 128], strides = [1, 1]} : vector<16x128xbf16> to vector<8x128xbf16>
    %78 = vector.extract_strided_slice %76 {offsets = [8, 0], sizes = [8, 128], strides = [1, 1]} : vector<16x128xbf16> to vector<8x128xbf16>
    %79 = tpu.concatenate %77, %78 in 1 : vector<8x128xbf16>, vector<8x128xbf16> -> vector<8x256xbf16>
    %cst_35 = arith.constant dense<0.000000e+00> : vector<16x256xf32>
    %80 = tpu.matmul %1, %79, %cst_35 {dimension_numbers = #tpu.dot_dimension_numbers<[1], [0], [0], [1], [0, 0, 1, 1], [], []>} : vector<16x8xbf16>, vector<8x256xbf16>, vector<16x256xf32> -> vector<16x256xf32>
    %81 = vector.extract_strided_slice %80 {offsets = [0, 0], sizes = [16, 128], strides = [1, 1]} : vector<16x256xf32> to vector<16x128xf32>
    %82 = vector.extract_strided_slice %80 {offsets = [0, 128], sizes = [16, 128], strides = [1, 1]} : vector<16x256xf32> to vector<16x128xf32>
    %83 = tpu.concatenate %81, %82 in 0 : vector<16x128xf32>, vector<16x128xf32> -> vector<32x128xf32>
    %84 = arith.truncf %83 : vector<32x128xf32> to vector<32x128xbf16>
    %c2_36 = arith.constant 2 : index
    %c0_37 = arith.constant 0 : index
    %c0_38 = arith.constant 0 : index
    %85 = vector.load %arg5[%c2_36, %c0_37, %c0_38] : memref<3x128x128xbf16, #tpu.memory_space<vmem>>, vector<1x128x128xbf16>
    %86 = vector.shape_cast %85 : vector<1x128x128xbf16> to vector<128x128xbf16>
    %cst_39 = arith.constant dense<0.000000e+00> : vector<32x128xf32>
    %87 = tpu.matmul %84, %86, %cst_39 {dimension_numbers = #tpu.dot_dimension_numbers<[1], [0], [0], [1], [0, 0, 1, 1], [], []>} : vector<32x128xbf16>, vector<128x128xbf16>, vector<32x128xf32> -> vector<32x128xf32>
    %cst_40 = arith.constant 0.000000e+00 : f32
    %88 = vector.broadcast %cst_40 : f32 to vector<32x128xf32>
    %89 = arith.maximumf %87, %88 : vector<32x128xf32>
    %90 = arith.truncf %89 : vector<32x128xf32> to vector<32x128xbf16>
    %c0_41 = arith.constant 0 : index
    %c0_42 = arith.constant 0 : index
    %91 = vector.load %arg6[%c0_41, %c0_42] : memref<128x512xbf16, #tpu.memory_space<vmem>>, vector<128x512xbf16>
    %cst_43 = arith.constant dense<0.000000e+00> : vector<32x512xf32>
    %92 = tpu.matmul %90, %91, %cst_43 {dimension_numbers = #tpu.dot_dimension_numbers<[1], [0], [0], [1], [0, 0, 1, 1], [], []>} : vector<32x128xbf16>, vector<128x512xbf16>, vector<32x512xf32> -> vector<32x512xf32>
    %cst_44 = arith.constant 0.000000e+00 : f32
    %93 = vector.broadcast %cst_44 : f32 to vector<32x512xf32>
    %94 = arith.maximumf %92, %93 : vector<32x512xf32>
    %c0_45 = arith.constant 0 : index
    %c0_46 = arith.constant 0 : index
    %95 = vector.load %arg7[%c0_45, %c0_46] : memref<1x512xbf16, #tpu.memory_space<vmem>>, vector<1x512xbf16>
    %96 = arith.truncf %94 : vector<32x512xf32> to vector<32x512xbf16>
    %cst_47 = arith.constant dense<0.000000e+00> : vector<1x32xf32>
    %97 = tpu.matmul %95, %96, %cst_47 {dimension_numbers = #tpu.dot_dimension_numbers<[1], [1], [0], [0], [0, 0, 1, 0], [], []>} : vector<1x512xbf16>, vector<32x512xbf16>, vector<1x32xf32> -> vector<1x32xf32>
    %cst_48 = arith.constant 0.0883883461 : f32
    %98 = vector.broadcast %cst_48 : f32 to vector<1x32xf32>
    %99 = arith.mulf %97, %98 : vector<1x32xf32>
    %100 = math.tanh %99 : vector<1x32xf32>
    %cst_49 = arith.constant 1.000000e+01 : f32
    %101 = vector.broadcast %cst_49 : f32 to vector<1x32xf32>
    %102 = arith.mulf %101, %100 : vector<1x32xf32>
    %c0_50 = arith.constant 0 : index
    %c0_51 = arith.constant 0 : index
    %c0_52 = arith.constant 0 : index
    %103 = vector.load %arg8[%c0_50, %c0_51, %c0_52] : memref<1x1x32xf32, #tpu.memory_space<vmem>>, vector<1x1x32xf32>
    %104 = vector.shape_cast %103 : vector<1x1x32xf32> to vector<1x32xf32>
    %105 = vector.shape_cast %102 : vector<1x32xf32> to vector<1x1x32xf32>
    tpu.vector_store %arg8[%c0_50, %c0_51, %c0_52], %105 {strides = array<i32>} : memref<1x1x32xf32, #tpu.memory_space<vmem>>, vector<1x1x32xf32>,
    return
  }
  func.func @transform_0(%arg0: i32) -> (i32, i32, i32) {
    %c0_i32 = arith.constant 0 : i32
    %c0_i32_0 = arith.constant 0 : i32
    %c0_i32_1 = arith.constant 0 : i32
    return %arg0, %c0_i32, %c0_i32_0 : i32, i32, i32
  }
  func.func @transform_1(%arg0: i32) -> (i32, i32, i32) {
    %c0_i32 = arith.constant 0 : i32
    %c0_i32_0 = arith.constant 0 : i32
    %c0_i32_1 = arith.constant 0 : i32
    return %arg0, %c0_i32, %c0_i32_0 : i32, i32, i32
  }
  func.func @transform_2(%arg0: i32) -> (i32, i32) {
    %c0_i32 = arith.constant 0 : i32
    %c0_i32_0 = arith.constant 0 : i32
    %c0_i32_1 = arith.constant 0 : i32
    return %c0_i32, %c0_i32_0 : i32, i32
  }
  func.func @transform_3(%arg0: i32) -> (i32, i32, i32) {
    %c0_i32 = arith.constant 0 : i32
    %c0_i32_0 = arith.constant 0 : i32
    %c0_i32_1 = arith.constant 0 : i32
    %c0_i32_2 = arith.constant 0 : i32
    return %c0_i32, %c0_i32_0, %c0_i32_1 : i32, i32, i32
  }
  func.func @transform_4(%arg0: i32) -> (i32, i32, i32) {
    %c0_i32 = arith.constant 0 : i32
    %c0_i32_0 = arith.constant 0 : i32
    %c0_i32_1 = arith.constant 0 : i32
    %c0_i32_2 = arith.constant 0 : i32
    return %c0_i32, %c0_i32_0, %c0_i32_1 : i32, i32, i32
  }
  func.func @transform_5(%arg0: i32) -> (i32, i32) {
    %c0_i32 = arith.constant 0 : i32
    %c0_i32_0 = arith.constant 0 : i32
    %c0_i32_1 = arith.constant 0 : i32
    return %c0_i32, %c0_i32_0 : i32, i32
  }
  func.func @transform_6(%arg0: i32) -> (i32, i32) {
    %c0_i32 = arith.constant 0 : i32
    %c0_i32_0 = arith.constant 0 : i32
    %c0_i32_1 = arith.constant 0 : i32
    return %c0_i32, %c0_i32_0 : i32, i32
  }
  func.func @transform_7(%arg0: i32) -> (i32, i32, i32) {
    %c0_i32 = arith.constant 0 : i32
    %c0_i32_0 = arith.constant 0 : i32
    %c0_i32_1 = arith.constant 0 : i32
    return %arg0, %c0_i32, %c0_i32_0 : i32, i32, i32
  }
}

</mosaic_0001>

<bundles_post_ra>
// kernel: tpu_custom_call.1
= control target key start
LH: loop header
LB: loop body
LE: loop exit
PB: predicated region body
PF: predicated region fallthrough
CT: control target
= control target key end

     0   :  { %12 = vsyncpa [#allocation3], 0  ;;  %s2933_s0 = inlined_call_operand.vmem [shape: bf16[2,32,4], index: 0, kind: input, shape index: {}]   ;;  %s2934_s1 = inlined_call_operand.vmem [shape: bf16[2,16,8], index: 1, kind: input, shape index: {}]   ;;  %s2935_s2 = inlined_call_operand.vmem [shape: bf16[4,128], index: 2, kind: input, shape index: {}]   ;;  %s2936_s3 = inlined_call_operand.hbm [shape: bf16[3,128,128], index: 3, kind: input, shape index: {}]   ;;  %s2937_s4 = inlined_call_operand.hbm [shape: bf16[3,128,128], index: 4, kind: input, shape index: {}]   ;;  %s2938_s5 = inlined_call_operand.hbm [shape: bf16[128,512], index: 5, kind: input, shape index: {}]   ;;  %s2939_s6 = inlined_call_operand.vmem [shape: bf16[1,512], index: 6, kind: input, shape index: {}]   ;;  %s2940_s7 = inlined_call_operand.hbm [shape: f32[2,1,32], index: 7, kind: output, shape index: {}]  }
   0x1   :  { %13 = vsyncpa [#allocation6], 0 }
   0x2   :  { %14 = vsyncpa [#allocation4], 0 }
   0x3   :  { %16 = vsyncpa [#allocation4 + $0x1], 0  ;;  %s2661_s24 = smov 0   ;;  %s2663_s25 = smov 0  }
   0x4   :  { %s2665_s26 = smov 0   ;;  %s2667_s27 = smov 0  }
   0x5 LB: > { %2947 = sst [smem:[#allocation12_spill]] %s2603_s26  ;;  %s2682_s28 = sadd.s32 4294967295, %s2607_s27   ;;  %s2607_s27 = sphi %s2667_s27, %s2962_s27   ;;  %s2603_s26 = sphi %s2665_s26, %s2964_s26   ;;  %s2599_s25 = sphi %s2663_s25, %s2966_s25   ;;  %s2595_s24 = sphi %s2661_s24, %s2965_s24  }
   0x6   : > { %s1969_s29 = sadd.s32 4294967294, %s2607_s27   ;;  %s2686_s30 = sadd.s32 1, %s2607_s27  }
   0x7   : > { %2948 = sst [smem:[#allocation13_spill]] %s2686_s30  ;;  %s186_s8 = sadd.s32 1, %s2603_s26 }
   0x8   : > { %s183_s9 = ssub.s32 %s2607_s27, %s2686_s30  ;;  %p196_p0 = scmp.ne.s32.totalorder %s2603_s26, %s2599_s25 }
   0x9   : > { %p184_p1 = scmp.eq.s32.totalorder %s183_s9, 0  ;;  %p197_p2 = scmp.eq.s32.totalorder %s2682_s28, 1 }
   0xa   : > { %p202_p3 = scmp.ne.s32.totalorder %s2599_s25, %s2595_s24  ;;  %p203_p4 = scmp.eq.s32.totalorder %s1969_s29, 1 }
   0xb   : > { %s2697_s10 = scalar_select %p184_p1, %s2603_s26, %s186_s8  }
   0xc   : > { %p2699_p5 = por %p197_p2, %p196_p0  ;;  %p2703_p6 = por %p203_p4, %p202_p3 }
   0xd   : > { %2949 = sst [smem:[#allocation14_spill]] %s2697_s10  ;;  %p1970_p7 = scmp.ge.s32.totalorder %s2607_s27, 1 }
   0xe   : > { %s2950_s11 = scalar_select %p2699_p5, 1, 0 }
   0xf   : > { %s2951_s12 = scalar_select %p2703_p6, 1, 0 }
  0x10   : > { %p210_p8 = scmp.lt.s32.totalorder %s2607_s27, 3  ;;  %p2941_p9 = scmp.eq.s32.totalorder %s2682_s28, 0 }
  0x11   : > { %s2609_s14 = smov [#allocation5]   ;;  %s2610_s17 = smov [#allocation2]  }
  0x12   : > { %p2710_p10 = pnand %p1970_p7, %p210_p8  ;;  %s238_s15 = sshll.u32 %s2609_s14, 4  ;;  %s2716_s15 = int_to_ptr.vmem [resolvable:$true] %s238_s15 }
  0x13   : > { %s225_s18 = sshll.u32 %s2610_s17, 4  ;;  %s2611_s19 = smov [#allocation7]   ;;  %s2724_s18 = int_to_ptr.vmem [resolvable:$true] %s225_s18 }
  0x14   : > { %s2952_s13 = scalar_select %p2710_p10, 1, 0 }
  0x15   : > { %p2288_p11 = pneg %p2710_p10  ;;  %s2726_s20 = sshll.u32 %s2611_s19, 4  ;;  %s252_s20 = int_to_ptr.vmem [resolvable:$true] %s2726_s20 }
  0x16   : > { %s2453_s23 = scalar_lea.hbm %s2937_s4, 3072 }
  0x17   : > { %p2720_p12 = pnand %p2941_p9, %p2288_p11  ;;  %p2454_p13 = scmp.ne.s32.totalorder %s2937_s4, %s2453_s23 }
  0x18   : > { %p2460_p3 = scmp.lt.u32.totalorder %s2453_s23, %s2937_s4 }
  0x19   : > { %p2736_p0 = pneg %p2720_p12 }
  0x1b   : > { %p2456_p1 = pnand %p2736_p0, %p2454_p13 }
  0x1d   : > { %p2457_p2 = pneg %p2456_p1 }
  0x1f   : > { %p2462_p4 = pnand %p2460_p3, %p2457_p2 }
  0x21   : > { %2465 = shalt.err (!%p2462_p4)
}
  0x22   : > { %s2466_s19 = scalar_lea.vmem %s2716_s15, 3072  ;;  %p2474_p9 = scmp.lt.s32.totalorder %s2716_s15, %s2716_s15 }
  0x23   : > { %p2467_p7 = scmp.ne.s32.totalorder %s2716_s15, %s2466_s19  ;;  %p2475_p6 = scmp.lt.s32.totalorder %s2466_s19, %s2466_s19 }
  0x25   : > { %p2469_p8 = pnand %p2467_p7, %p2736_p0  ;;  %p2476_p13 = por %p2475_p6, %p2474_p9 }
  0x27   : > { %p2470_p11 = pneg %p2469_p8 }
  0x29   : > { %p2477_p1 = pnand %p2476_p13, %p2470_p11 }
  0x2b   : > { %2480 = shalt.err (!%p2477_p1)
}
  0x2c   : > { %s2612_s21 = smov 64   ;;  %s2613_s22 = smov 4  }
  0x2d   : > { %2294 = dma.hbm_to_vmem [thread:$0]  (!%p2720_p12), %s2937_s4, 3072, %s2716_s15, [#allocation6], %s2612_s21, %s2612_s21, %s2613_s22  }
  0x2e   : > { %s2481_s17 = scalar_lea.hbm %s2936_s3, 3072 }
  0x2f   : > { %p2482_p6 = scmp.ne.s32.totalorder %s2936_s3, %s2481_s17  ;;  %p2488_p3 = scmp.lt.u32.totalorder %s2481_s17, %s2936_s3 }
  0x31   : > { %p2484_p9 = pnand %p2482_p6, %p2736_p0 }
  0x33   : > { %p2485_p2 = pneg %p2484_p9 }
  0x35   : > { %p2490_p4 = pnand %p2488_p3, %p2485_p2 }
  0x37   : > { %2493 = shalt.err (!%p2490_p4)
}
  0x38   : > { %s2494_s15 = scalar_lea.vmem %s2724_s18, 3072  ;;  %p2502_p13 = scmp.lt.s32.totalorder %s2724_s18, %s2724_s18 }
  0x39   : > { %p2495_p7 = scmp.ne.s32.totalorder %s2724_s18, %s2494_s15  ;;  %p2503_p1 = scmp.lt.s32.totalorder %s2494_s15, %s2494_s15 }
  0x3b   : > { %p2497_p8 = pnand %p2495_p7, %p2736_p0  ;;  %p2504_p6 = por %p2503_p1, %p2502_p13 }
  0x3d   : > { %p2498_p11 = pneg %p2497_p8 }
  0x3f   : > { %p2505_p9 = pnand %p2504_p6, %p2498_p11 }
  0x41   : > { %2508 = shalt.err (!%p2505_p9)
}
  0x42   : > { %2291 = dma.hbm_to_vmem [thread:$0]  (!%p2720_p12), %s2936_s3, 3072, %s2724_s18, [#allocation3], %s2612_s21, %s2612_s21, %s2613_s22  }
  0x43   : > { %s2509_s29 = scalar_lea.hbm %s2938_s5, 4096 }
  0x44   : > { %p2510_p2 = scmp.ne.s32.totalorder %s2938_s5, %s2509_s29  ;;  %p2516_p7 = scmp.lt.u32.totalorder %s2509_s29, %s2938_s5 }
  0x46   : > { %p2512_p3 = pnand %p2510_p2, %p2736_p0 }
  0x48   : > { %p2513_p4 = pneg %p2512_p3 }
  0x4a   : > { %p2518_p8 = pnand %p2516_p7, %p2513_p4 }
  0x4c   : > { %2521 = shalt.err (!%p2518_p8)
}
  0x4d   : > { %s2522_s15 = scalar_lea.vmem %s252_s20, 4096  ;;  %p2530_p6 = scmp.lt.s32.totalorder %s252_s20, %s252_s20 }
  0x4e   : > { %p2523_p11 = scmp.ne.s32.totalorder %s252_s20, %s2522_s15  ;;  %p2531_p9 = scmp.lt.s32.totalorder %s2522_s15, %s2522_s15 }
  0x50   : > { %p2525_p13 = pnand %p2523_p11, %p2736_p0  ;;  %p2532_p5 = por %p2531_p9, %p2530_p6 }
  0x52   : > { %p2526_p1 = pneg %p2525_p13 }
  0x54   : > { %p2533_p10 = pnand %p2532_p5, %p2526_p1 }
  0x56   : > { %2536 = shalt.err (!%p2533_p10)
}
  0x57   : > { %s2614_s18 = smov 256   ;;  %s2615_s21 = smov 16  }
  0x58   : > { %2297 = dma.hbm_to_vmem [thread:$0]  (!%p2720_p12), %s2938_s5, 4096, %s252_s20, [#allocation6], %s2614_s18, %s2614_s18, %s2615_s21  }
  0x59   : > { %p2955_p2 = scmp.ne.s32.totalorder %s2952_s13, 0 }
  0x5a   : > { %p2956_p3 = scmp.eq.s32.totalorder (!%p2955_p2), %s2682_s28, 0 }
  0x5b   : > { %286 = sbr.rel (%p2955_p2) target bundleno = 3454 (0xd7e), region = 48 }
  0x62   : > { %2582 = dma.done.wait (%p2956_p3), [#allocation3], 3072   ;;  %p2957_p0 = pmov %p2956_p3 }
  0x64   : > { %2584 = vsyncadd (%p2957_p0), [#allocation3], 4294964224  ;;  %p2958_p5 = pmov %p2957_p0 }
  0x65   : > { %p2959_p10 = pmov %p2957_p0 }
  0x66   : > { %2586 = dma.done.wait (%p2958_p5), [#allocation6], 7168  }
  0x67   : > { %2588 = vsyncadd (%p2959_p10), [#allocation6], 4294960128  ;;  %p330_p4 = scmp.lt.s32.totalorder %s2682_s28, 1  ;;  %vm365_vm0 = vcmask 1041408   ;;  %vm358_vm1 = vcmask 31744   ;;  %v2616_v5 = vmov 0  }
  0x68   : > { %v347_v0 = vld [vmem:[%s2935_s2] sm:$0x3]  ;;  %478 = vmatprep.mubr.bf16.mxu1 %v2616_v5  ;;  %v2617_v7 = vmov 0.0   ;;  %v2356_v8 = vld [vmem:[#allocation2 + $0x8] sm:$0xff]   ;;  %v2357_v9 = vld [vmem:[#allocation2 + $0x10] sm:$0xff]   ;;  %vm442_vm2 = vcmask 130048  }
  0x69   : > { %s331_s16 = scalar_select %p330_p4, %s2682_s28, 1  ;;  %2273 = vmatprep.subr.msk.bf16.mxu0 %vm365_vm0, %v347_v0  ;;  %v367_v1 = vsel %vm365_vm0, %v347_v0, 0  ;;  %v2355_v6 = vld [vmem:[#allocation2] sm:$0xff]   ;;  %v2358_v10 = vld [vmem:[#allocation2 + $0x18] sm:$0xff]   ;;  %v2360_v12 = vld [vmem:[#allocation2 + $0x28] sm:$0xff]   ;;  %vm2618_vm3 = vmmov 0  }
  0x6a   : > { %2144 = vmatpush3.bf16.msra.mxu0 %v367_v1  ;;  %v2359_v11 = vld [vmem:[#allocation2 + $0x20] sm:$0xff]   ;;  %v2361_v13 = vld [vmem:[#allocation2 + $0x30] sm:$0xff]   ;;  %v2362_v21 = vld [vmem:[#allocation2 + $0x38] sm:$0xff]   ;;  %vm602_vm4 = vcmask 1043456   ;;  %vm598_vm5 = vcmask 64512   ;;  %s328_s18 = sand.u32 1, %s2599_s25  }
  0x6b   : > { %s2081_s20 = sshll.u32 %s331_s16, 4  ;;  %s2082_s9 = sshll.u32 %s331_s16, 3  ;;  %2149 = vmatprep.subr.bf16.mxu0 %v2617_v7  ;;  %v2363_v35 = vld [vmem:[#allocation5] sm:$0xff]   ;;  %v2364_v37 = vld [vmem:[#allocation5 + $0x8] sm:$0xff]   ;;  %v2365_v38 = vld [vmem:[#allocation5 + $0x10] sm:$0xff]   ;;  %vm1856_vm6 = vcmask 253952  }
  0x6c   : > { %s334_s10 = scalar_lea.vmem %s2933_s0, %s2081_s20  ;;  %s339_s17 = scalar_lea.vmem %s2934_s1, %s2082_s9  ;;  %v2366_v39 = vld [vmem:[#allocation5 + $0x18] sm:$0xff]   ;;  %v2367_v40 = vld [vmem:[#allocation5 + $0x20] sm:$0xff]   ;;  %v2368_v41 = vld [vmem:[#allocation5 + $0x28] sm:$0xff]  }
  0x6d   : > { %v2352_v2 = vld [vmem:[%s334_s10] sm:$0xff]   ;;  %v2353_v3 = vld [vmem:[%s334_s10 + $0x8] sm:$0xff]   ;;  %v2369_v42 = vld [vmem:[#allocation5 + $0x30] sm:$0xff]   ;;  %s2078_s21 = sshll.u32 %s2682_s28, 4  ;;  %s329_s22 = scalar_lea.vmem [#allocation8], %s328_s18 }
  0x6e   : > { %2145 = vmatprep.mubr.msk.bf16.mxu0 %vm358_vm1, %v2352_v2  ;;  %v2820_v4 = vld [vmem:[%s339_s17] sm:$0xff]   ;;  %v2370_v43 = vld [vmem:[#allocation5 + $0x38] sm:$0xff]   ;;  %v2372_v51 = vld [vmem:[#allocation2 + $0x48] sm:$0xff]   ;;  %s1871_s26 = sshll.u32 %s329_s22, 4  ;;  %s2891_s9 = scalar_lea.hbm %s2940_s7, %s2078_s21  ;;  %s2893_s26 = int_to_ptr.vmem [resolvable:$true] %s1871_s26 }
  0x6f   : > { %2146 = vmatmul.mubr.msk.bf16.vlgmr.msra.gmra.mrb[0].mxu0 %vm358_vm1, %v2353_v3  ;;  %426 = vxpose.xlu0.c.b16.start.end [1/1] (short) (narrow) %v2820_v4, 16  ;;  %v2371_v50 = vld [vmem:[#allocation2 + $0x40] sm:$0xff]   ;;  %v2373_v52 = vld [vmem:[#allocation2 + $0x50] sm:$0xff]   ;;  %v2374_v53 = vld [vmem:[#allocation2 + $0x58] sm:$0xff]   ;;  %s1859_s13 = scalar_lea.sflag [#allocation4], %s328_s18  ;;  %s2537_s30 = scalar_lea.vmem %s2893_s26, 16 }
  0x70   : > { %2150 = vmatpush3.bf16.msra.mxu0 %v2355_v6  ;;  %2165 = vmatprep.mubr.msk.bf16.mxu0 %vm2618_vm3, %v2617_v7  ;;  %v2375_v54 = vld [vmem:[#allocation2 + $0x60] sm:$0xff]   ;;  %v2376_v55 = vld [vmem:[#allocation2 + $0x68] sm:$0xff]   ;;  %v2377_v56 = vld [vmem:[#allocation2 + $0x70] sm:$0xff]   ;;  %p2538_p12 = scmp.ne.s32.totalorder %s2893_s26, %s2537_s30  ;;  %p2960_p7 = scmp.ne.s32.totalorder %s2950_s11, 0 }
  0x71   : > { %2151 = vmatprep.subr.bf16.mxu0 %v2617_v7  ;;  %v2378_v3 = vld [vmem:[#allocation2 + $0x78] sm:$0xff]   ;;  %s2620_s28 = smov [#allocation8]  }
  0x72   : > { %p2539_p8 = pnand %p2538_p12, %p2960_p7  ;;  %s2541_s10 = sshll.u32 %s2620_s28, 4  ;;  %s2542_s10 = int_to_ptr.vmem [resolvable:$false] %s2541_s10 }
  0x73   : > { %s2543_s23 = scalar_lea.vmem %s2542_s10, 32  ;;  %p2544_p13 = scmp.lt.s32.totalorder %s2893_s26, %s2542_s10 }
  0x74   : > { %2152 = vmatpush3.bf16.msra.mxu0 %v2356_v8  ;;  %p2540_p11 = pneg %p2539_p8  ;;  %p2545_p1 = scmp.lt.s32.totalorder %s2543_s23, %s2537_s30 }
  0x75   : > { %2153 = vmatprep.subr.bf16.mxu0 %v2617_v7 }
  0x76   : > { %p2546_p6 = por %p2545_p1, %p2544_p13 }
  0x78   : > { %2154 = vmatpush3.bf16.msra.mxu0 %v2357_v9  ;;  %p2547_p9 = pnand %p2546_p6, %p2540_p11 }
  0x79   : > { %2155 = vmatprep.subr.bf16.mxu0 %v2617_v7 }
  0x7c   : > { %2156 = vmatpush3.bf16.msra.mxu0 %v2358_v10 }
  0x7d   : > { %2157 = vmatprep.subr.bf16.mxu0 %v2617_v7 }
  0x80   : > { %2158 = vmatpush3.bf16.msra.mxu0 %v2359_v11 }
  0x81   : > { %2159 = vmatprep.subr.bf16.mxu0 %v2617_v7 }
  0x84   : > { %2160 = vmatpush3.bf16.msra.mxu0 %v2360_v12 }
  0x85   : > { %2161 = vmatprep.subr.bf16.mxu0 %v2617_v7 }
  0x88   : > { %2162 = vmatpush3.bf16.msra.mxu0 %v2361_v13 }
  0x89   : > { %2163 = vmatprep.subr.bf16.mxu0 %v2617_v7 }
  0x8c   : > { %2164 = vmatpush3.bf16.msra.mxu0 %v2362_v21  ;;  %v2379_v21 = vld [vmem:[#allocation5 + $0x40] sm:$0xff]  }
  0x8d   : > { %2189 = vmatprep.subr.bf16.mxu0 %v2617_v7 }
  0xd5   : > { %v2832_v20 = vpop.trf.xlu0 }
 0x142   : > { %v2147_v14 = vpop.f32.mrb[0].mxu0 }
 0x143   : > { %v403_v15 = vpop.f32.mrb[1].mxu0 }
 0x144   : > { %v2148_v16 = vpop.f32.mrb[2].mxu0 }
 0x145   : > { %v406_v17 = vpop.f32.mrb[3].mxu0  ;;  %v419_v18 = vpack.c.bf16 %v2148_v16, %v2147_v14 }
 0x146   : > { %v418_v19 = vpack.c.bf16 %v406_v17, %v403_v15 }
 0x147   : > { %446 = vmatprep.subr.bf16.mxu1 %v419_v18 }
 0x148   : > { %447 = vmatpush1.bf16.msra.mxu1 %v418_v19 }
 0x14b   : > { %1988 = vmatmul.mubr.msk.bf16.vlgmr.msra.gmra.mrb[0].mxu1 %vm442_vm2, %v2832_v20 }
 0x14c   : > { %641 = vmatprep.mubr.bf16.mxu1 %v2616_v5 }
 0x21e   : > { %v480_v22 = vpop.f32.mrb[0].mxu1 }
 0x21f   : > { %v482_v23 = vpop.f32.mrb[1].mxu1 }
 0x220   : > { %v487_v24 = vpack.c.bf16 %v482_v23, %v480_v22  ;;  %v484_v25 = vpop.f32.mrb[2].mxu1  ;;  %v2380_v23 = vld [vmem:[#allocation5 + $0x48] sm:$0xff]  }
 0x221   : > { %v485_v26 = vpop.f32.mrb[3].mxu1  ;;  %v2382_v25 = vld [vmem:[#allocation5 + $0x58] sm:$0xff]  }
 0x222   : > { %2166 = vmatmul.mubr.bf16.vlgmr.msra.gmra.mrb[4].mxu0 %v487_v24  ;;  %v2381_v24 = vld [vmem:[#allocation5 + $0x50] sm:$0xff]   ;;  %v2383_v26 = vld [vmem:[#allocation5 + $0x60] sm:$0xff]  }
 0x223   : > { %2205 = vmatprep.mubr.msk.bf16.mxu0 %vm2618_vm3, %v2617_v7  ;;  %2190 = vmatpush3.bf16.msra.mxu0 %v2371_v50  ;;  %v2391_v50 = vld [vmem:[#allocation2 + $0xa0] sm:$0xff]  }
 0x224   : > { %2191 = vmatprep.subr.bf16.mxu0 %v2617_v7 }
 0x227   : > { %2192 = vmatpush3.bf16.msra.mxu0 %v2372_v51  ;;  %v2393_v51 = vld [vmem:[#allocation2 + $0xb0] sm:$0xff]  }
 0x228   : > { %2193 = vmatprep.subr.bf16.mxu0 %v2617_v7 }
 0x22b   : > { %2194 = vmatpush3.bf16.msra.mxu0 %v2373_v52  ;;  %v2394_v52 = vld [vmem:[#allocation2 + $0xb8] sm:$0xff]  }
 0x22c   : > { %2195 = vmatprep.subr.bf16.mxu0 %v2617_v7 }
 0x22f   : > { %2196 = vmatpush3.bf16.msra.mxu0 %v2374_v53 }
 0x230   : > { %2197 = vmatprep.subr.bf16.mxu0 %v2617_v7 }
 0x233   : > { %2198 = vmatpush3.bf16.msra.mxu0 %v2375_v54 }
 0x234   : > { %2199 = vmatprep.subr.bf16.mxu0 %v2617_v7 }
 0x237   : > { %2200 = vmatpush3.bf16.msra.mxu0 %v2376_v55 }
 0x238   : > { %2201 = vmatprep.subr.bf16.mxu0 %v2617_v7 }
 0x23b   : > { %2202 = vmatpush3.bf16.msra.mxu0 %v2377_v56 }
 0x23c   : > { %2203 = vmatprep.subr.bf16.mxu0 %v2617_v7 }
 0x23f   : > { %2204 = vmatpush3.bf16.msra.mxu0 %v2378_v3  ;;  %v2396_v3 = vld [vmem:[#allocation5 + $0x88] sm:$0xff]  }
 0x2f5   : > { %v586_v27 = vpop.f32.mrb[4].mxu0 }
 0x2f6   : > { %v2167_v28 = vpop.f32.mrb[5].mxu0  ;;  %v593_v30 = vmax.f32 %v586_v27, 0.0  ;;  %v2384_v27 = vld [vmem:[#allocation5 + $0x68] sm:$0xff]  }
 0x2f7   : > { %v589_v29 = vpop.f32.mrb[6].mxu0  ;;  %v2385_v28 = vld [vmem:[#allocation5 + $0x70] sm:$0xff]  }
 0x2f8   : > { %v594_v31 = vmax.f32 %v589_v29, 0.0  ;;  %v2168_v32 = vpop.f32.mrb[7].mxu0  ;;  %v2386_v29 = vld [vmem:[#allocation5 + $0x78] sm:$0xff]  }
 0x2fa   : > { %v595_v33 = vpack.c.bf16 %v594_v31, %v593_v30 }
 0x2fc   : > { %v597_v34 = vrot.slane %v595_v33, 4  ;;  %v604_v36 = vsel %vm602_vm4, %v595_v33, 0 }
 0x2fe   : > { %1997 = vmatprep.subr.msk.bf16.mxu1 %vm602_vm4, %v597_v34 }
 0x2ff   : > { %610 = vmatpush1.bf16.msra.mxu1 %v604_v36 }
 0x300   : > { %2169 = vmatprep.subr.bf16.mxu1 %v2363_v35 }
 0x302   : > { %1998 = vmatmul.mubr.msk.bf16.vlgmr.msra.gmra.mrb[4].mxu1 %vm598_vm5, %v2820_v4 }
 0x303   : > { %2170 = vmatpush3.bf16.msra.mxu1 %v2363_v35 }
 0x304   : > { %2171 = vmatprep.subr.bf16.mxu1 %v2364_v37 }
 0x307   : > { %2172 = vmatpush3.bf16.msra.mxu1 %v2364_v37 }
 0x308   : > { %2173 = vmatprep.subr.bf16.mxu1 %v2365_v38 }
 0x30b   : > { %2174 = vmatpush3.bf16.msra.mxu1 %v2365_v38 }
 0x30c   : > { %2175 = vmatprep.subr.bf16.mxu1 %v2366_v39 }
 0x30f   : > { %2176 = vmatpush3.bf16.msra.mxu1 %v2366_v39 }
 0x310   : > { %2177 = vmatprep.subr.bf16.mxu1 %v2367_v40 }
 0x313   : > { %2178 = vmatpush3.bf16.msra.mxu1 %v2367_v40 }
 0x314   : > { %2179 = vmatprep.subr.bf16.mxu1 %v2368_v41 }
 0x317   : > { %2180 = vmatpush3.bf16.msra.mxu1 %v2368_v41 }
 0x318   : > { %2181 = vmatprep.subr.bf16.mxu1 %v2369_v42 }
 0x31b   : > { %2182 = vmatpush3.bf16.msra.mxu1 %v2369_v42 }
 0x31c   : > { %2183 = vmatprep.subr.bf16.mxu1 %v2370_v43 }
 0x31f   : > { %2184 = vmatpush3.bf16.msra.mxu1 %v2370_v43 }
 0x3d5   : > { %v643_v44 = vpop.f32.mrb[4].mxu1 }
 0x3d6   : > { %v645_v45 = vpop.f32.mrb[5].mxu1 }
 0x3d7   : > { %v647_v46 = vpop.f32.mrb[6].mxu1 }
 0x3d8   : > { %v652_v47 = vpack.c.bf16 %v647_v46, %v643_v44  ;;  %v649_v48 = vpop.f32.mrb[7].mxu1  ;;  %v2387_v46 = vld [vmem:[#allocation2 + $0x80] sm:$0xff]  }
 0x3d9   : > { %v653_v49 = vpack.c.bf16 %v649_v48, %v645_v45  ;;  %v2389_v48 = vld [vmem:[#allocation2 + $0x90] sm:$0xff]  }
 0x3da   : > { %2185 = vmatprep.mubr.bf16.mxu1 %v652_v47  ;;  %v2388_v47 = vld [vmem:[#allocation2 + $0x88] sm:$0xff]  }
 0x3db   : > { %2186 = vmatmul.mubr.bf16.vlgmr.msra.gmra.mrb[8].mxu1 %v653_v49  ;;  %v2390_v49 = vld [vmem:[#allocation2 + $0x98] sm:$0xff]  }
 0x3dc   : > { %805 = vmatprep.mubr.bf16.mxu1 %v2616_v5 }
 0x4ae   : > { %v2187_v57 = vpop.f32.mrb[8].mxu1 }
 0x4af   : > { %v752_v58 = vpop.f32.mrb[9].mxu1  ;;  %v769_v60 = vmax.f32 %v2187_v57, 0.0 }
 0x4b0   : > { %v2188_v59 = vpop.f32.mrb[10].mxu1  ;;  %v767_v63 = vmax.f32 %v752_v58, 0.0 }
 0x4b1   : > { %v770_v61 = vmax.f32 %v2188_v59, 0.0  ;;  %v755_v62 = vpop.f32.mrb[11].mxu1 }
 0x4b2   : > { %v768_v0 = vmax.f32 %v755_v62, 0.0 }
 0x4b3   : > { %v772_v1 = vpack.c.bf16 %v770_v61, %v769_v60 }
 0x4b4   : > { %v771_v2 = vpack.c.bf16 %v768_v0, %v767_v63 }
 0x4b5   : > { %773 = vmatprep.subr.bf16.mxu1 %v772_v1 }
 0x4b6   : > { %774 = vmatpush1.bf16.msra.mxu1 %v771_v2  ;;  %v2395_v2 = vld [vmem:[#allocation5 + $0x80] sm:$0xff]  }
 0x4b9   : > { %2007 = vmatmul.mubr.msk.bf16.vlgmr.msra.gmra.mrb[12].mxu1 %vm442_vm2, %v2832_v20 }
 0x4ba   : > { %964 = vmatprep.mubr.bf16.mxu1 %v2616_v5 }
 0x58c   : > { %v807_v6 = vpop.f32.mrb[12].mxu1 }
 0x58d   : > { %v809_v8 = vpop.f32.mrb[13].mxu1 }
 0x58e   : > { %v814_v9 = vpack.c.bf16 %v809_v8, %v807_v6  ;;  %v811_v10 = vpop.f32.mrb[14].mxu1  ;;  %v2397_v6 = vld [vmem:[#allocation5 + $0x90] sm:$0xff]   ;;  %v2398_v8 = vld [vmem:[#allocation5 + $0x98] sm:$0xff]  }
 0x58f   : > { %v812_v11 = vpop.f32.mrb[15].mxu1  ;;  %v2400_v10 = vld [vmem:[#allocation5 + $0xa8] sm:$0xff]  }
 0x590   : > { %2206 = vmatmul.mubr.bf16.vlgmr.msra.gmra.mrb[8].mxu0 %v814_v9  ;;  %v2399_v9 = vld [vmem:[#allocation5 + $0xa0] sm:$0xff]   ;;  %v2401_v11 = vld [vmem:[#allocation5 + $0xb0] sm:$0xff]  }
 0x591   : > { %1129 = vmatprep.mubr.bf16.mxu0 %v2616_v5 }
 0x663   : > { %v914_v12 = vpop.f32.mrb[8].mxu0 }
 0x664   : > { %v2207_v13 = vpop.f32.mrb[9].mxu0  ;;  %v921_v15 = vmax.f32 %v914_v12, 0.0  ;;  %v2402_v12 = vld [vmem:[#allocation5 + $0xb8] sm:$0xff]  }
 0x665   : > { %v917_v14 = vpop.f32.mrb[10].mxu0  ;;  %v2405_v13 = vld [vmem:[#allocation7 + $0x4] ss:$16 sps:$4 sm:$0xff]  }
 0x666   : > { %v922_v16 = vmax.f32 %v917_v14, 0.0  ;;  %v2208_v17 = vpop.f32.mrb[11].mxu0  ;;  %v2408_v14 = vld [vmem:[#allocation7 + $0xc] ss:$16 sps:$4 sm:$0xff]  }
 0x667   : > { %v2417_v17 = vld [vmem:[#allocation7 + $0x44] ss:$16 sps:$4 sm:$0xff]  }
 0x668   : > { %v923_v18 = vpack.c.bf16 %v922_v16, %v921_v15  ;;  %v2411_v15 = vld [vmem:[#allocation7 + $0x24] ss:$16 sps:$4 sm:$0xff]   ;;  %v2409_v16 = vld [vmem:[#allocation7 + $0x20] ss:$16 sps:$4 sm:$0xff]  }
 0x66a   : > { %v925_v19 = vrot.slane %v923_v18, 4  ;;  %v927_v22 = vsel %vm602_vm4, %v923_v18, 0  ;;  %v2415_v18 = vld [vmem:[#allocation7 + $0x40] ss:$16 sps:$4 sm:$0xff]  }
 0x66c   : > { %2016 = vmatprep.subr.msk.bf16.mxu1 %vm602_vm4, %v925_v19  ;;  %v2423_v19 = vld [vmem:[#allocation7 + $0x64] ss:$16 sps:$4 sm:$0xff]  }
 0x66d   : > { %933 = vmatpush1.bf16.msra.mxu1 %v927_v22  ;;  %v2429_v22 = vld [vmem:[#allocation7 + $0x84] ss:$16 sps:$4 sm:$0xff]  }
 0x66e   : > { %2209 = vmatprep.subr.bf16.mxu1 %v2379_v21 }
 0x670   : > { %2017 = vmatmul.mubr.msk.bf16.vlgmr.msra.gmra.mrb[16].mxu1 %vm598_vm5, %v2820_v4 }
 0x671   : > { %2210 = vmatpush3.bf16.msra.mxu1 %v2379_v21  ;;  %v2421_v21 = vld [vmem:[#allocation7 + $0x60] ss:$16 sps:$4 sm:$0xff]  }
 0x672   : > { %2211 = vmatprep.subr.bf16.mxu1 %v2380_v23 }
 0x675   : > { %2212 = vmatpush3.bf16.msra.mxu1 %v2380_v23  ;;  %v2427_v23 = vld [vmem:[#allocation7 + $0x80] ss:$16 sps:$4 sm:$0xff]  }
 0x676   : > { %2213 = vmatprep.subr.bf16.mxu1 %v2381_v24 }
 0x679   : > { %2214 = vmatpush3.bf16.msra.mxu1 %v2381_v24  ;;  %v2435_v24 = vld [vmem:[#allocation7 + $0xa4] ss:$16 sps:$4 sm:$0xff]  }
 0x67a   : > { %2215 = vmatprep.subr.bf16.mxu1 %v2382_v25 }
 0x67d   : > { %2216 = vmatpush3.bf16.msra.mxu1 %v2382_v25  ;;  %v2433_v25 = vld [vmem:[#allocation7 + $0xa0] ss:$16 sps:$4 sm:$0xff]  }
 0x67e   : > { %2217 = vmatprep.subr.bf16.mxu1 %v2383_v26 }
 0x681   : > { %2218 = vmatpush3.bf16.msra.mxu1 %v2383_v26 }
 0x682   : > { %2219 = vmatprep.subr.bf16.mxu1 %v2384_v27 }
 0x685   : > { %2220 = vmatpush3.bf16.msra.mxu1 %v2384_v27 }
 0x686   : > { %2221 = vmatprep.subr.bf16.mxu1 %v2385_v28 }
 0x689   : > { %2222 = vmatpush3.bf16.msra.mxu1 %v2385_v28 }
 0x68a   : > { %2223 = vmatprep.subr.bf16.mxu1 %v2386_v29 }
 0x68d   : > { %2224 = vmatpush3.bf16.msra.mxu1 %v2386_v29 }
 0x743   : > { %v966_v30 = vpop.f32.mrb[16].mxu1 }
 0x744   : > { %v968_v31 = vpop.f32.mrb[17].mxu1 }
 0x745   : > { %v970_v32 = vpop.f32.mrb[18].mxu1 }
 0x746   : > { %v975_v33 = vpack.c.bf16 %v970_v32, %v966_v30  ;;  %v972_v34 = vpop.f32.mrb[19].mxu1 }
 0x747   : > { %v976_v35 = vpack.c.bf16 %v972_v34, %v968_v31  ;;  %v2406_v31 = vld [vmem:[#allocation7 + $0x8] ss:$16 sps:$4 sm:$0xff]  }
 0x748   : > { %2225 = vmatprep.mubr.bf16.mxu1 %v975_v33  ;;  %v2414_v33 = vld [vmem:[#allocation7 + $0x2c] ss:$16 sps:$4 sm:$0xff]   ;;  %v2412_v34 = vld [vmem:[#allocation7 + $0x28] ss:$16 sps:$4 sm:$0xff]  }
 0x749   : > { %2226 = vmatmul.mubr.bf16.vlgmr.msra.gmra.mrb[20].mxu1 %v976_v35  ;;  %v2420_v35 = vld [vmem:[#allocation7 + $0x4c] ss:$16 sps:$4 sm:$0xff]  }
 0x74a   : > { %1288 = vmatprep.mubr.bf16.mxu1 %v2616_v5 }
 0x81c   : > { %v2227_v36 = vpop.f32.mrb[20].mxu1 }
 0x81d   : > { %v1076_v37 = vpop.f32.mrb[21].mxu1  ;;  %v1093_v39 = vmax.f32 %v2227_v36, 0.0  ;;  %v2418_v36 = vld [vmem:[#allocation7 + $0x48] ss:$16 sps:$4 sm:$0xff]  }
 0x81e   : > { %v2228_v38 = vpop.f32.mrb[22].mxu1  ;;  %v1091_v42 = vmax.f32 %v1076_v37, 0.0  ;;  %v2426_v37 = vld [vmem:[#allocation7 + $0x6c] ss:$16 sps:$4 sm:$0xff]  }
 0x81f   : > { %v1094_v40 = vmax.f32 %v2228_v38, 0.0  ;;  %v1079_v41 = vpop.f32.mrb[23].mxu1  ;;  %v2424_v38 = vld [vmem:[#allocation7 + $0x68] ss:$16 sps:$4 sm:$0xff]  }
 0x820   : > { %v1092_v43 = vmax.f32 %v1079_v41, 0.0  ;;  %v2438_v41 = vld [vmem:[#allocation7 + $0xac] ss:$16 sps:$4 sm:$0xff]  }
 0x821   : > { %v1096_v44 = vpack.c.bf16 %v1094_v40, %v1093_v39  ;;  %v2432_v39 = vld [vmem:[#allocation7 + $0x8c] ss:$16 sps:$4 sm:$0xff]   ;;  %v2430_v40 = vld [vmem:[#allocation7 + $0x88] ss:$16 sps:$4 sm:$0xff]  }
 0x822   : > { %v1095_v45 = vpack.c.bf16 %v1092_v43, %v1091_v42  ;;  %v2436_v42 = vld [vmem:[#allocation7 + $0xa8] ss:$16 sps:$4 sm:$0xff]   ;;  %v2441_v43 = vld [vmem:[#allocation7 + $0xc4] ss:$16 sps:$4 sm:$0xff]  }
 0x823   : > { %1097 = vmatprep.subr.bf16.mxu0 %v1096_v44  ;;  %v2444_v44 = vld [vmem:[#allocation7 + $0xcc] ss:$16 sps:$4 sm:$0xff]  }
 0x824   : > { %1098 = vmatpush1.bf16.msra.mxu0 %v1095_v45  ;;  %v2439_v45 = vld [vmem:[#allocation7 + $0xc0] ss:$16 sps:$4 sm:$0xff]  }
 0x825   : > { %2229 = vmatprep.subr.bf16.mxu0 %v2617_v7 }
 0x827   : > { %2026 = vmatmul.mubr.msk.bf16.vlgmr.msra.gmra.mrb[12].mxu0 %vm442_vm2, %v2832_v20  ;;  %v2392_v20 = vld [vmem:[#allocation2 + $0xa8] sm:$0xff]  }
 0x828   : > { %2230 = vmatpush3.bf16.msra.mxu0 %v2387_v46  ;;  %2245 = vmatprep.mubr.msk.bf16.mxu0 %vm2618_vm3, %v2617_v7  ;;  %v2442_v46 = vld [vmem:[#allocation7 + $0xc8] ss:$16 sps:$4 sm:$0xff]  }
 0x829   : > { %2231 = vmatprep.subr.bf16.mxu0 %v2617_v7 }
 0x82c   : > { %2232 = vmatpush3.bf16.msra.mxu0 %v2388_v47  ;;  %v2447_v47 = vld [vmem:[#allocation7 + $0xe4] ss:$16 sps:$4 sm:$0xff]  }
 0x82d   : > { %2233 = vmatprep.subr.bf16.mxu0 %v2617_v7 }
 0x830   : > { %2234 = vmatpush3.bf16.msra.mxu0 %v2389_v48  ;;  %v2450_v48 = vld [vmem:[#allocation7 + $0xec] ss:$16 sps:$4 sm:$0xff]  }
 0x831   : > { %2235 = vmatprep.subr.bf16.mxu0 %v2617_v7 }
 0x834   : > { %2236 = vmatpush3.bf16.msra.mxu0 %v2390_v49  ;;  %v2445_v49 = vld [vmem:[#allocation7 + $0xe0] ss:$16 sps:$4 sm:$0xff]  }
 0x835   : > { %2237 = vmatprep.subr.bf16.mxu0 %v2617_v7 }
 0x838   : > { %2238 = vmatpush3.bf16.msra.mxu0 %v2391_v50  ;;  %v2448_v50 = vld [vmem:[#allocation7 + $0xe8] ss:$16 sps:$4 sm:$0xff]  }
 0x839   : > { %2239 = vmatprep.subr.bf16.mxu0 %v2617_v7 }
 0x83c   : > { %2240 = vmatpush3.bf16.msra.mxu0 %v2392_v20 }
 0x83d   : > { %2241 = vmatprep.subr.bf16.mxu0 %v2617_v7 }
 0x840   : > { %2242 = vmatpush3.bf16.msra.mxu0 %v2393_v51 }
 0x841   : > { %2243 = vmatprep.subr.bf16.mxu0 %v2617_v7 }
 0x844   : > { %2244 = vmatpush3.bf16.msra.mxu0 %v2394_v52 }
 0x845   : > { %1613 = vmatprep.subr.bf16.mxu0 %v2405_v13 }
 0x8fa   : > { %v1131_v53 = vpop.f32.mrb[12].mxu0 }
 0x8fb   : > { %v1133_v54 = vpop.f32.mrb[13].mxu0 }
 0x8fc   : > { %v1138_v55 = vpack.c.bf16 %v1133_v54, %v1131_v53  ;;  %v1135_v56 = vpop.f32.mrb[14].mxu0 }
 0x8fd   : > { %v1136_v57 = vpop.f32.mrb[15].mxu0 }
 0x8fe   : > { %2246 = vmatmul.mubr.bf16.vlgmr.msra.gmra.mrb[16].mxu0 %v1138_v55 }
 0x8ff   : > { %1645 = vmatprep.mubr.bf16.mxu0 %v2616_v5 }
 0x9d1   : > { %v1238_v58 = vpop.f32.mrb[16].mxu0 }
 0x9d2   : > { %v2247_v59 = vpop.f32.mrb[17].mxu0  ;;  %v1245_v61 = vmax.f32 %v1238_v58, 0.0 }
 0x9d3   : > { %v1241_v60 = vpop.f32.mrb[18].mxu0 }
 0x9d4   : > { %v1246_v62 = vmax.f32 %v1241_v60, 0.0  ;;  %v2248_v63 = vpop.f32.mrb[19].mxu0  ;;  %v2619_v60 = vmov 1966171168  }
 0x9d5   : > { %v2077_v63 = vld.sshfl [vmem:[%s2939_s6] sm:$0x33 pattern:$0x75316420] }
 0x9d6   : > { %v1247_v0 = vpack.c.bf16 %v1246_v62, %v1245_v61  ;;  %v1754_v61 = vunpack.c.l.s4 %v2619_v60  ;;  %v1756_v62 = vlaneseq }
 0x9d8   : > { %v1249_v1 = vrot.slane %v1247_v0, 4  ;;  %v1251_v7 = vsel %vm602_vm4, %v1247_v0, 0  ;;  %v1755_v0 = vunpack.c.0.s8 %v1754_v61 }
 0x9da   : > { %2035 = vmatprep.subr.msk.bf16.mxu1 %vm602_vm4, %v1249_v1  ;;  %v1757_v1 = vshrl.u32 %v1756_v62, 7 }
 0x9db   : > { %1257 = vmatpush1.bf16.msra.mxu1 %v1251_v7 }
 0x9dc   : > { %2249 = vmatprep.subr.bf16.mxu1 %v2395_v2  ;;  %v1758_v7 = vsub.s32 %v1755_v0, %v1757_v1 }
 0x9de   : > { %2036 = vmatmul.mubr.msk.bf16.vlgmr.msra.gmra.mrb[24].mxu1 %vm598_vm5, %v2820_v4  ;;  %v2403_v4 = vld [vmem:[#allocation7] ss:$16 sps:$4 sm:$0xff]  }
 0x9df   : > { %2250 = vmatpush3.bf16.msra.mxu1 %v2395_v2  ;;  %1614 = vmatpush1.bf16.msra.mxu0 %v2403_v4  ;;  %v1752_v2 = vcombine.high %v2077_v63, %v2077_v63 }
 0x9e0   : > { %2251 = vmatprep.subr.bf16.mxu1 %v2396_v3  ;;  %1615 = vmatprep.subr.bf16.mxu0 %v2411_v15 }
 0x9e3   : > { %2252 = vmatpush3.bf16.msra.mxu1 %v2396_v3  ;;  %1616 = vmatpush1.bf16.msra.mxu0 %v2409_v16  ;;  %v1759_v3 = vrot.slane %v2077_v63, %v1758_v7 }
 0x9e4   : > { %2253 = vmatprep.subr.bf16.mxu1 %v2397_v6  ;;  %1617 = vmatprep.subr.bf16.mxu0 %v2417_v17 }
 0x9e7   : > { %2254 = vmatpush3.bf16.msra.mxu1 %v2397_v6  ;;  %1618 = vmatpush1.bf16.msra.mxu0 %v2415_v18  ;;  %v1766_v6 = vrot.slane %v1752_v2, %v1758_v7 }
 0x9e8   : > { %2255 = vmatprep.subr.bf16.mxu1 %v2398_v8  ;;  %1619 = vmatprep.subr.bf16.mxu0 %v2423_v19 }
 0x9eb   : > { %2256 = vmatpush3.bf16.msra.mxu1 %v2398_v8  ;;  %1620 = vmatpush1.bf16.msra.mxu0 %v2421_v21 }
 0x9ec   : > { %2257 = vmatprep.subr.bf16.mxu1 %v2399_v9  ;;  %1621 = vmatprep.subr.bf16.mxu0 %v2429_v22 }
 0x9ef   : > { %2258 = vmatpush3.bf16.msra.mxu1 %v2399_v9  ;;  %1622 = vmatpush1.bf16.msra.mxu0 %v2427_v23 }
 0x9f0   : > { %2259 = vmatprep.subr.bf16.mxu1 %v2400_v10  ;;  %1623 = vmatprep.subr.bf16.mxu0 %v2435_v24 }
 0x9f3   : > { %2260 = vmatpush3.bf16.msra.mxu1 %v2400_v10  ;;  %1624 = vmatpush1.bf16.msra.mxu0 %v2433_v25 }
 0x9f4   : > { %2261 = vmatprep.subr.bf16.mxu1 %v2401_v11  ;;  %1625 = vmatprep.subr.bf16.mxu0 %v2441_v43 }
 0x9f7   : > { %2262 = vmatpush3.bf16.msra.mxu1 %v2401_v11  ;;  %1626 = vmatpush1.bf16.msra.mxu0 %v2439_v45 }
 0x9f8   : > { %2263 = vmatprep.subr.bf16.mxu1 %v2402_v12  ;;  %1627 = vmatprep.subr.bf16.mxu0 %v2447_v47  ;;  %v1768_v47 = vcombine.high %v1766_v6, %v1766_v6 }
 0x9fb   : > { %2264 = vmatpush3.bf16.msra.mxu1 %v2402_v12  ;;  %1628 = vmatpush1.bf16.msra.mxu0 %v2445_v49 }
 0x9fc   : > { %1666 = vmatprep.subr.bf16.mxu1 %v2408_v14 }
 0xab1   : > { %v1290_v26 = vpop.f32.mrb[24].mxu1 }
 0xab2   : > { %v1292_v27 = vpop.f32.mrb[25].mxu1 }
 0xab3   : > { %v1294_v28 = vpop.f32.mrb[26].mxu1 }
 0xab4   : > { %v1299_v29 = vpack.c.bf16 %v1294_v28, %v1290_v26  ;;  %v1296_v30 = vpop.f32.mrb[27].mxu1 }
 0xab5   : > { %v1300_v32 = vpack.c.bf16 %v1296_v30, %v1292_v27 }
 0xab6   : > { %2265 = vmatprep.mubr.bf16.mxu1 %v1299_v29 }
 0xab7   : > { %2266 = vmatmul.mubr.bf16.vlgmr.msra.gmra.mrb[28].mxu1 %v1300_v32 }
 0xab8   : > { %1667 = vmatpush1.bf16.msra.mxu1 %v2406_v31  ;;  %1698 = vmatprep.mubr.bf16.mxu1 %v2616_v5 }
 0xab9   : > { %1668 = vmatprep.subr.bf16.mxu1 %v2414_v33 }
 0xabc   : > { %1669 = vmatpush1.bf16.msra.mxu1 %v2412_v34 }
 0xabd   : > { %1670 = vmatprep.subr.bf16.mxu1 %v2420_v35 }
 0xac0   : > { %1671 = vmatpush1.bf16.msra.mxu1 %v2418_v36 }
 0xac1   : > { %1672 = vmatprep.subr.bf16.mxu1 %v2426_v37 }
 0xac4   : > { %1673 = vmatpush1.bf16.msra.mxu1 %v2424_v38 }
 0xac5   : > { %1674 = vmatprep.subr.bf16.mxu1 %v2432_v39 }
 0xac8   : > { %1675 = vmatpush1.bf16.msra.mxu1 %v2430_v40 }
 0xac9   : > { %1676 = vmatprep.subr.bf16.mxu1 %v2438_v41 }
 0xacc   : > { %1677 = vmatpush1.bf16.msra.mxu1 %v2436_v42 }
 0xacd   : > { %1678 = vmatprep.subr.bf16.mxu1 %v2444_v44 }
 0xad0   : > { %1679 = vmatpush1.bf16.msra.mxu1 %v2442_v46 }
 0xad1   : > { %1680 = vmatprep.subr.bf16.mxu1 %v2450_v48  ;;  %v1767_v48 = vcombine.high %v1759_v3, %v1759_v3 }
 0xad4   : > { %1681 = vmatpush1.bf16.msra.mxu1 %v2448_v50 }
 0xb8a   : > { %v2267_v20 = vpop.f32.mrb[28].mxu1 }
 0xb8b   : > { %v1400_v51 = vpop.f32.mrb[29].mxu1  ;;  %v1417_v53 = vmax.f32 %v2267_v20, 0.0 }
 0xb8c   : > { %v2268_v52 = vpop.f32.mrb[30].mxu1  ;;  %v1415_v56 = vmax.f32 %v1400_v51, 0.0 }
 0xb8d   : > { %v1418_v54 = vmax.f32 %v2268_v52, 0.0  ;;  %v1403_v55 = vpop.f32.mrb[31].mxu1 }
 0xb8e   : > { %v1416_v57 = vmax.f32 %v1403_v55, 0.0 }
 0xb8f   : > { %v1420_v58 = vpack.c.bf16 %v1418_v54, %v1417_v53 }
 0xb90   : > { %v1419_v59 = vpack.c.bf16 %v1416_v57, %v1415_v56 }
 0xb92   : > { %1646 = vmatmul.mubr.bf16.vlgmr.msra.gmra.mrb[20].mxu0 %v1419_v59  ;;  %1699 = vmatmul.mubr.bf16.vlgmr.msra.gmra.mrb[32].mxu1 %v1419_v59 }
 0xb93   : > { %1655 = vmatprep.mubr.bf16.mxu0 %v2616_v5  ;;  %1708 = vmatprep.mubr.bf16.mxu1 %v2616_v5 }
 0xb9a   : > { %1656 = vmatmul.mubr.bf16.gmra.mrb[24].mxu0 %v1420_v58  ;;  %1709 = vmatmul.mubr.bf16.gmra.mrb[36].mxu1 %v1420_v58 }
 0xb9b   : > { %1805 = vmatprep.mubr.bf16.mxu0 %v1766_v6 }
 0xc65   : > { %v1647_v8 = vpop.f32.mrb[20].mxu0  ;;  %v1700_v9 = vpop.f32.mrb[32].mxu1 }
 0xc66   : > { %v1649_v10 = vpop.f32.mrb[21].mxu0  ;;  %v1702_v5 = vpop.f32.mrb[33].mxu1  ;;  %v1719_v4 = vmax.f32 %v1647_v8, 0.0  ;;  %v1721_v13 = vmax.f32 %v1700_v9, 0.0 }
 0xc67   : > { %v1651_v11 = vpop.f32.mrb[22].mxu0  ;;  %v1704_v12 = vpop.f32.mrb[34].mxu1  ;;  %v1720_v18 = vmax.f32 %v1649_v10, 0.0  ;;  %v1722_v19 = vmax.f32 %v1702_v5, 0.0 }
 0xc68   : > { %v1723_v14 = vmax.f32 %v1651_v11, 0.0  ;;  %v1725_v15 = vmax.f32 %v1704_v12, 0.0  ;;  %v1653_v16 = vpop.f32.mrb[23].mxu0  ;;  %v1706_v17 = vpop.f32.mrb[35].mxu1 }
 0xc69   : > { %v1724_v21 = vmax.f32 %v1653_v16, 0.0  ;;  %v1726_v22 = vmax.f32 %v1706_v17, 0.0 }
 0xc6a   : > { %v1736_v23 = vpack.c.bf16 %v1723_v14, %v1719_v4  ;;  %v1738_v24 = vpack.c.bf16 %v1725_v15, %v1721_v13 }
 0xc6b   : > { %v1737_v25 = vpack.c.bf16 %v1724_v21, %v1720_v18  ;;  %v1739_v26 = vpack.c.bf16 %v1726_v22, %v1722_v19 }
 0xc6d   : > { %v1657_v27 = vpop.f32.mrb[24].mxu0  ;;  %v1710_v28 = vpop.f32.mrb[36].mxu1  ;;  %1773 = vmatprep.subr.bf16.mxu0 %v1737_v25 }
 0xc6e   : > { %v1659_v29 = vpop.f32.mrb[25].mxu0  ;;  %v1712_v30 = vpop.f32.mrb[37].mxu1  ;;  %1774 = vmatpush1.bf16.xpose.msra.mxu0 %v1736_v23  ;;  %v1727_v33 = vmax.f32 %v1657_v27, 0.0  ;;  %v1729_v34 = vmax.f32 %v1710_v28, 0.0 }
 0xc6f   : > { %v1661_v31 = vpop.f32.mrb[26].mxu0  ;;  %v1714_v32 = vpop.f32.mrb[38].mxu1  ;;  %v1728_v39 = vmax.f32 %v1659_v29, 0.0  ;;  %v1730_v40 = vmax.f32 %v1712_v30, 0.0 }
 0xc70   : > { %v1731_v35 = vmax.f32 %v1661_v31, 0.0  ;;  %v1733_v36 = vmax.f32 %v1714_v32, 0.0  ;;  %v1663_v37 = vpop.f32.mrb[27].mxu0  ;;  %v1716_v38 = vpop.f32.mrb[39].mxu1 }
 0xc71   : > { %v1732_v41 = vmax.f32 %v1663_v37, 0.0  ;;  %v1734_v42 = vmax.f32 %v1716_v38, 0.0 }
 0xc72   : > { %v1740_v43 = vpack.c.bf16 %v1731_v35, %v1727_v33  ;;  %v1742_v44 = vpack.c.bf16 %v1733_v36, %v1729_v34 }
 0xc73   : > { %v1741_v45 = vpack.c.bf16 %v1732_v41, %v1728_v39  ;;  %v1743_v46 = vpack.c.bf16 %v1734_v42, %v1730_v40 }
 0xc75   : > { %1775 = vmatprep.subr.bf16.mxu0 %v1741_v45 }
 0xc76   : > { %1776 = vmatpush1.bf16.xpose.msra.mxu0 %v1740_v43 }
 0xc77   : > { %1813 = vmatprep.subr.bf16.mxu0 %v1739_v26 }
 0xc7d   : > { %1806 = vmatmul.mubr.bf16.vlgmr.msra.gmra.mrb[28].mxu0 %v1759_v3 }
 0xc7e   : > { %1814 = vmatpush1.bf16.xpose.msra.mxu0 %v1738_v24  ;;  %1845 = vmatprep.mubr.bf16.mxu0 %v1768_v47 }
 0xc7f   : > { %1815 = vmatprep.subr.bf16.mxu0 %v1743_v46 }
 0xc86   : > { %1816 = vmatpush1.bf16.xpose.msra.mxu0 %v1742_v44 }
 0xc8d   : > { %1846 = vmatmul.mubr.bf16.vlgmr.msra.gmra.mrb[28].mxu0 %v1767_v48 }
 0xd60   : > { %v1847_v49 = vpop.f32.mrb[28].mxu0 }
 0xd61   : > { %v1853_v50 = vmul.f32 0.088388346, %v1847_v49  ;;  %v1849_v20 = vpop.f32.mrb[29].mxu0 }
 0xd62   : > { %v1850_v51 = vpop.f32.mrb[30].mxu0 }
 0xd63   : > { %2451 = vtanh.f32 %v1853_v50  ;;  %v1851_v52 = vpop.f32.mrb[31].mxu0 }
 0xd6d   : > { %v2452_v53 = vpop.eup %2451 }
 0xd6e   : > { %v1855_v54 = vmul.f32 10.0, %v2452_v53 }
 0xd70   : > { %1857 = vst.msk [vmem:[%s329_s22] sm:$0x1] %vm1856_vm6, %v1855_v54 }
 0xd71   : > { %2550 = shalt.err (!%p2547_p9)
}
 0xd72   : > { %s2551_s29 = scalar_lea.hbm %s2891_s9, 16  ;;  %s2555_s17 = scalar_lea.hbm %s2940_s7, 32 }
 0xd73   : > { %p2552_p2 = scmp.ne.s32.totalorder %s2891_s9, %s2551_s29  ;;  %p2556_p5 = scmp.lt.u32.totalorder %s2891_s9, %s2940_s7 }
 0xd74   : > { %p2557_p10 = scmp.lt.u32.totalorder %s2555_s17, %s2551_s29  ;;  %p2559_p12 = scmp.lt.u32.totalorder %s2551_s29, %s2891_s9 }
 0xd75   : > { %p2553_p3 = pnand %p2552_p2, %p2960_p7 }
 0xd76   : > { %p2558_p4 = por %p2557_p10, %p2556_p5 }
 0xd77   : > { %p2554_p0 = pneg %p2553_p3 }
 0xd78   : > { %p2560_p8 = por %p2559_p12, %p2558_p4 }
 0xd7a   : > { %p2561_p11 = pnand %p2560_p8, %p2554_p0 }
 0xd7c   : > { %2564 = shalt.err (!%p2561_p11)
}
 0xd7d   : > { %2286 = dma.vmem_to_hbm [thread:$0]  (%p2960_p7), %s2893_s26, 16, %s2891_s9, %s1859_s13  }
 0xd7e PF: > { %p2308_p13 = scmp.ge.s32.totalorder %s2607_s27, 2  ;;  %s1883_s18 = sand.u32 1, %s2595_s24  }
 0xd7f   : > { %p2961_p1 = scmp.ne.s32.totalorder %s2951_s12, 0  ;;  %s1884_s21 = scalar_lea.sflag [#allocation4], %s1883_s18 }
 0xd81   : > { %p2299_p6 = pnand %p2308_p13, %p2961_p1 }
 0xd83   : > { %2590 = dma.done.wait (!%p2299_p6), %s1884_s21, 16  }
 0xd84   : > { %2592 = vsyncadd (!%p2299_p6), %s1884_s21, 4294967280  ;;  %s2962_s27 = sld [smem:[#allocation13_spill]]  ;;  %s2963_s22 = sld [smem:[#allocation12_spill]] }
 0xd85   : > { %s2964_s26 = sld [smem:[#allocation14_spill]]  ;;  %s2965_s24 = smov %s2599_s25 }
 0xd8a   : > { %p19_p9 = scmp.ge.s32.totalorder %s2962_s27, 4   ;;  %s2966_s25 = smov %s2963_s22 }
 0xd8c   :  { %21 = sbr.rel (!%p19_p9) target bundleno = 5 (0x5), region = 103 }
 0xd93   :  { %1888 = vsyncpa [#allocation3], 1 }
 0xd94   :  { %1890 = vsyncpa [#allocation3 + $0x1], 1 }
 0xd95   :  { %1891 = vsyncpa [#allocation6], 1 }
 0xd96   :  { %1892 = vsyncpa [#allocation4], 1 }
 0xd97   :  { %1894 = vsyncpa [#allocation4 + $0x1], 1 }

</bundles_post_ra>
